<compile_context>
chip_gen: v6e
topology: v6e:2x2x1
jax: 0.10.0
libtpu: 0.0.40
codegen_flags: <defaults>
</compile_context>

<pallas_src>
import functools

import jax
import jax.numpy as jnp
from jax import lax
from jax.experimental import pallas as pl
from jax.experimental.pallas import tpu as pltpu


# -----------------------------------------------------------------------------
# Kernel 1: farthest point sampling   xyz [B,3,N] -> new_xyz [B,3,S]
# -----------------------------------------------------------------------------
def fps_kernel(npoint, xyz_ref, out_ref):
    xyz = xyz_ref[0].astype(jnp.float32)                          # [3, N]
    N = xyz.shape[1]
    iota_n = lax.broadcasted_iota(jnp.int32, (1, N), 1)
    iota_s = lax.broadcasted_iota(jnp.int32, (1, npoint), 1)

    def body(i, carry):
        dist, far, sel = carry          # [1,N] f32, [1,1] i32, [3,S] f32
        far_mask = iota_n == far                                  # [1, N]
        centroid = jnp.sum(jnp.where(far_mask, xyz, 0.0),
                           axis=1, keepdims=True)                 # [3, 1]
        sel = jnp.where(iota_s == i,
                        jnp.broadcast_to(centroid, sel.shape), sel)
        d = jnp.sum((xyz - centroid) ** 2, axis=0, keepdims=True)  # [1, N]
        dist = jnp.minimum(dist, d)
        maxv = jnp.max(dist, axis=1, keepdims=True)               # [1, 1]
        far = jnp.min(jnp.where(dist == maxv, iota_n, N),
                      axis=1, keepdims=True).astype(jnp.int32)    # [1, 1]
        return dist, far, sel

    # TODO(synk): PyTorch uses torch.randint for the initial farthest point;
    # we use a deterministic start index 0 (forward is otherwise identical).
    init = (jnp.full((1, N), 1e10, jnp.float32),
            jnp.zeros((1, 1), jnp.int32),
            jnp.zeros((3, npoint), jnp.float32))
    _, _, sel = lax.fori_loop(0, npoint, body, init)
    out_ref[0] = sel.astype(out_ref.dtype)


def fps_pallas(xyz, npoint):
    B, C, N = xyz.shape
    return pl.pallas_call(
        functools.partial(fps_kernel, npoint),
        out_shape=jax.ShapeDtypeStruct((B, 3, npoint), jnp.float32),
        grid_spec=pltpu.PrefetchScalarGridSpec(
            num_scalar_prefetch=0,
            grid=(B,),
            in_specs=[pl.BlockSpec((1, 3, N), lambda b: (b, 0, 0))],
            out_specs=pl.BlockSpec((1, 3, npoint), lambda b: (b, 0, 0)),
        ),
        compiler_params=pltpu.CompilerParams(
            dimension_semantics=("parallel",)),
    )(xyz)


# -----------------------------------------------------------------------------
# Kernel 2: fused per-scale  ball-query + grouping + MLP stack + max-over-K
#   inputs  : xyz [B,3,N], feats [B,D,N], new_xyz (both layouts), folded W/b
#   output  : [B, C_last, S]   (channel-first, lane-dense over S)
# -----------------------------------------------------------------------------
def msg_scale_kernel(num_layers, nsample, radius_sq, *refs):
    xyz_ref, feats_ref, nxyz_cl_ref, nxyz_cf_ref = refs[:4]
    wb_refs = refs[4:4 + 2 * num_layers]
    out_ref = refs[4 + 2 * num_layers]

    xyz = xyz_ref[0].astype(jnp.float32)        # [3, N]
    feats = feats_ref[0].astype(jnp.float32)    # [D, N]
    nxyz_cl = nxyz_cl_ref[0].astype(jnp.float32)  # [TS, 3]  (centers, row-major)
    nxyz_cf = nxyz_cf_ref[0].astype(jnp.float32)  # [3, TS]  (centers, channel-first)
    TS = nxyz_cl.shape[0]
    N = xyz.shape[1]

    # Hoist the (tiny) folded weights out of the K loop.
    ws = [wb_refs[2 * l][...].astype(jnp.float32) for l in range(num_layers)]
    bs = [wb_refs[2 * l + 1][...].astype(jnp.float32) for l in range(num_layers)]

    # Squared center->point distances [TS, N] with 3 unrolled VPU FMAs
    # (no K=3 matmul; keeps the MXU free and N in the lane dimension).
    d = jnp.zeros((TS, N), jnp.float32)
    for c in range(3):
        diff = nxyz_cl[:, c:c + 1] - xyz[c:c + 1, :]              # [TS, N]
        d = d + diff * diff

    in_ball = d <= radius_sq                                       # [TS, N]
    in_f = in_ball.astype(jnp.float32)

    # Exclusive prefix count of in-ball points along N via one MXU matmul with
    # a strictly-lower-triangular ones matrix:
    #   rank[s, m] = #(in-ball points of center s with index < m)
    # TODO(synk): for very large N this [N,N] helper should become a tiled scan.
    row = lax.broadcasted_iota(jnp.int32, (N, N), 0)
    col = lax.broadcasted_iota(jnp.int32, (N, N), 1)
    lt = (row < col).astype(jnp.float32)
    rank = jnp.dot(in_f, lt, preferred_element_type=jnp.float32)   # [TS, N]
    count = jnp.sum(in_f, axis=-1, keepdims=True)                  # [TS, 1]
    first_sel = jnp.where(in_ball & (rank == 0.0), 1.0, 0.0)       # first in-ball point

    dn_contract = (((1,), (1,)), ((), ()))   # contract over N (lhs dim1, rhs dim1)

    mx = None
    for k in range(nsample):
        # k-th neighbour one-hot: the in-ball point with the k-th smallest
        # index, padded with the first in-ball point when count <= k
        # (exact query_ball_point semantics).
        sel_k = jnp.where(in_ball & (rank == float(k)), 1.0, 0.0)
        sel = jnp.where(count > float(k), sel_k, first_sel)        # [TS, N]

        # Gather via one-hot MXU matmuls (exact: one 1.0 per row).
        gx_cf = lax.dot_general(xyz, sel, dn_contract,
                                preferred_element_type=jnp.float32)   # [3, TS]
        gf_cf = lax.dot_general(feats, sel, dn_contract,
                                preferred_element_type=jnp.float32)   # [D, TS]

        # torch.cat([grouped_points, grouped_xyz - center], dim=channel)
        x_cf = jnp.concatenate([gf_cf, gx_cf - nxyz_cf], axis=0)   # [D+3, TS]

        # Folded 1x1 Conv + BN(eval) + ReLU stack, channel-first so the lane
        # dimension stays TS (lane-dense all the way to the store).
        for l in range(num_layers):
            x_cf = jnp.maximum(
                jnp.dot(ws[l], x_cf, preferred_element_type=jnp.float32)
                + bs[l], 0.0)                                      # [C_l, TS]

        mx = x_cf if mx is None else jnp.maximum(mx, x_cf)

    out_ref[0] = mx.astype(out_ref.dtype)                          # [C_last, TS]


def msg_scale(xyz, feats, nxyz_cl, nxyz_cf, folded, radius, nsample, *, tile_s):
    B, _, N = xyz.shape
    D = feats.shape[1]
    S = nxyz_cl.shape[1]
    num_layers = len(folded)
    c_last = folded[-1][0].shape[0]

    wb_inputs, wb_specs = [], []
    for w, b in folded:
        wb_inputs += [w, b]
        wb_specs += [pl.BlockSpec(w.shape, lambda bb, ss: (0, 0)),
                     pl.BlockSpec(b.shape, lambda bb, ss: (0, 0))]

    kernel = functools.partial(msg_scale_kernel, num_layers, nsample,
                               float(radius) * float(radius))
    return pl.pallas_call(
        kernel,
        out_shape=jax.ShapeDtypeStruct((B, c_last, S), jnp.float32),
        grid_spec=pltpu.PrefetchScalarGridSpec(
            num_scalar_prefetch=0,
            grid=(B, S // tile_s),
            in_specs=[
                pl.BlockSpec((1, 3, N), lambda b, s: (b, 0, 0)),
                pl.BlockSpec((1, D, N), lambda b, s: (b, 0, 0)),
                pl.BlockSpec((1, tile_s, 3), lambda b, s: (b, s, 0)),
                pl.BlockSpec((1, 3, tile_s), lambda b, s: (b, 0, s)),
            ] + wb_specs,
            out_specs=pl.BlockSpec((1, c_last, tile_s), lambda b, s: (b, 0, s)),
        ),
        compiler_params=pltpu.CompilerParams(
            dimension_semantics=("parallel", "parallel")),
    )(xyz, feats, nxyz_cl, nxyz_cf, *wb_inputs)


# -----------------------------------------------------------------------------
# Parameters (Conv2d k=1 + BatchNorm2d, folded for eval-mode inference)
# -----------------------------------------------------------------------------
def init_params_msg(key, in_channel, mlp_list):
    params = []
    for mlp in mlp_list:
        layer_params = []
        last = in_channel + 3
        for out_ch in mlp:
            key, k1, k2, k3, k4, k5 = jax.random.split(key, 6)
            layer_params.append(dict(
                conv_w=0.1 * jax.random.normal(k1, (out_ch, last), jnp.float32),
                conv_b=0.1 * jax.random.normal(k2, (out_ch,), jnp.float32),
                gamma=1.0 + 0.05 * jax.random.normal(k3, (out_ch,), jnp.float32),
                beta=0.05 * jax.random.normal(k4, (out_ch,), jnp.float32),
                mean=0.05 * jax.random.normal(k5, (out_ch,), jnp.float32),
                var=jnp.ones((out_ch,), jnp.float32)))
            last = out_ch
        params.append(layer_params)
    return params


def fold_bn(p, eps=1e-5):
    """Fold Conv(1x1) + eval-mode BN into W [Cout,Cin] and bias column [Cout,1]."""
    s = p["gamma"] / jnp.sqrt(p["var"] + eps)
    w_cf = p["conv_w"] * s[:, None]
    b_col = ((p["conv_b"] - p["mean"]) * s + p["beta"])[:, None]
    return w_cf, b_col


# -----------------------------------------------------------------------------
# Module forward (PyTorch layout in / out)
# -----------------------------------------------------------------------------
def pointnet_sa_msg_forward(params_msg, radius_list, nsample_list, npoint,
                            xyz, points, *, tile_s=None):
    """xyz [B,3,N], points [B,D,N] -> (new_xyz [B,3,S], new_points [B,sumC,S])."""
    # TODO(synk): points=None path (grouped_xyz only) not implemented; the
    # reference module only supports it when built with in_channel matching.
    B, C, N = xyz.shape
    assert C == 3
    S = npoint

    new_xyz_cf = fps_pallas(xyz, S)                         # [B, 3, S]
    new_xyz_cl = jnp.transpose(new_xyz_cf, (0, 2, 1))       # [B, S, 3] (tiny)

    if tile_s is None:
        tile_s = 128 if S % 128 == 0 else S

    outs = []
    for i, radius in enumerate(radius_list):
        folded = [fold_bn(p) for p in params_msg[i]]
        outs.append(msg_scale(xyz, points, new_xyz_cl, new_xyz_cf, folded,
                              radius, int(nsample_list[i]), tile_s=tile_s))
    return new_xyz_cf, jnp.concatenate(outs, axis=1)


# -----------------------------------------------------------------------------
# Pure-JAX reference (mirrors the PyTorch forward, FPS start index 0)
# -----------------------------------------------------------------------------
def reference_forward(params_msg, radius_list, nsample_list, npoint, xyz, points):
    xyz_t = jnp.transpose(xyz, (0, 2, 1))       # [B, N, 3]
    pts_t = jnp.transpose(points, (0, 2, 1))    # [B, N, D]
    B, N, _ = xyz_t.shape
    S = npoint

    def fps_one(pts):
        def body(i, carry):
            dist, far, idxs = carry
            idxs = idxs.at[i].set(far)
            centroid = pts[far]
            d = jnp.sum((pts - centroid) ** 2, axis=-1)
            dist = jnp.minimum(dist, d)
            far = jnp.argmax(dist).astype(jnp.int32)
            return dist, far, idxs
        init = (jnp.full((N,), 1e10, jnp.float32), jnp.int32(0),
                jnp.zeros((S,), jnp.int32))
        return lax.fori_loop(0, S, body, init)[2]

    idx = jax.vmap(fps_one)(xyz_t)                                  # [B, S]
    new_xyz = jnp.take_along_axis(xyz_t, idx[..., None], axis=1)    # [B, S, 3]

    outs = []
    for i, radius in enumerate(radius_list):
        K = int(nsample_list[i])
        diff = new_xyz[:, :, None, :] - xyz_t[:, None, :, :]
        sqrd = jnp.sum(diff * diff, axis=-1)                        # [B, S, N]
        arange = jnp.arange(N, dtype=jnp.int32)[None, None, :]
        grp = jnp.where(sqrd > radius ** 2, N, arange)
        grp = jnp.sort(grp, axis=-1)[:, :, :K]
        first = grp[:, :, :1]
        grp = jnp.where(grp == N, first, grp)                       # [B, S, K]
        gxyz = jnp.take_along_axis(xyz_t[:, None], grp[..., None], axis=2)
        gxyz = gxyz - new_xyz[:, :, None, :]                        # [B, S, K, 3]
        gpts = jnp.take_along_axis(pts_t[:, None], grp[..., None], axis=2)
        x = jnp.concatenate([gpts, gxyz], axis=-1)                  # [B, S, K, D+3]
        for p in params_msg[i]:
            w_cf, b_col = fold_bn(p)
            x = jnp.maximum(jnp.einsum('bskc,oc->bsko', x, w_cf,
                                       precision='highest') + b_col[:, 0], 0.0)
        outs.append(jnp.max(x, axis=2))                             # [B, S, C]
    new_points = jnp.concatenate(outs, axis=-1)
    return (jnp.transpose(new_xyz, (0, 2, 1)),
            jnp.transpose(new_points, (0, 2, 1)))


if __name__ == "__main__":
    key = jax.random.PRNGKey(0)
    B, N = 2, 128
    in_channel = 8
    npoint = 64
    radius_list = [0.5, 1.0]
    nsample_list = [8, 16]
    mlp_list = [[16, 32], [16, 32, 64]]

    k1, k2, k3 = jax.random.split(key, 3)
    xyz = jax.random.normal(k1, (B, 3, N), jnp.float32)
    points = jax.random.normal(k2, (B, in_channel, N), jnp.float32)
    params = init_params_msg(k3, in_channel, mlp_list)

    new_xyz, new_points = pointnet_sa_msg_forward(
        params, radius_list, nsample_list, npoint, xyz, points)
    new_xyz = jax.block_until_ready(new_xyz)
    new_points = jax.block_until_ready(new_points)

    c_total = sum(m[-1] for m in mlp_list)
    assert new_xyz.shape == (B, 3, npoint), new_xyz.shape
    assert new_points.shape == (B, c_total, npoint), new_points.shape

    ref_xyz, ref_points = reference_forward(
        params, radius_list, nsample_list, npoint, xyz, points)
    ref_xyz = jax.block_until_ready(ref_xyz)
    ref_points = jax.block_until_ready(ref_points)

    assert jnp.allclose(new_xyz, ref_xyz, rtol=2e-3, atol=2e-3), \
        float(jnp.max(jnp.abs(new_xyz - ref_xyz)))
    assert jnp.allclose(new_points, ref_points, rtol=2e-3, atol=2e-3), \
        float(jnp.max(jnp.abs(new_points - ref_points)))

    print("KERNEL_OK")
</pallas_src>

<mosaic_0001>
module attributes {stable_mosaic.version = 11 : i64} {
  func.func @fps_kernel(%arg0: i32, %arg1: memref<1x3x128xf32, #tpu.memory_space<vmem>>, %arg2: memref<1x3x64xf32, #tpu.memory_space<vmem>>) attributes {dimension_semantics = [#tpu.dimension_semantics<parallel>], iteration_bounds = array<i64: 2>, scalar_prefetch = 0 : i64, scratch_operands = 0 : i64, tpu.core_type = #tpu.core_type<tc>, window_params = [{transform_indices = @transform_0, window_bounds = array<i64: 1, 3, 128>}, {transform_indices = @transform_1, window_bounds = array<i64: 1, 3, 64>}]} {
    %c0 = arith.constant 0 : index
    %c0_0 = arith.constant 0 : index
    %c0_1 = arith.constant 0 : index
    %0 = vector.load %arg1[%c0, %c0_0, %c0_1] : memref<1x3x128xf32, #tpu.memory_space<vmem>>, vector<1x3x128xf32>
    %1 = vector.shape_cast %0 : vector<1x3x128xf32> to vector<3x128xf32>
    %2 = tpu.iota {dimensions = array<i32: 1>} : vector<1x128xi32>
    %3 = tpu.iota {dimensions = array<i32: 1>} : vector<1x64xi32>
    %cst = arith.constant 1.000000e+10 : f32
    %4 = vector.broadcast %cst : f32 to vector<1x128xf32>
    %c0_i32 = arith.constant 0 : i32
    %5 = vector.broadcast %c0_i32 : i32 to vector<1x1xi32>
    %cst_2 = arith.constant 0.000000e+00 : f32
    %6 = vector.broadcast %cst_2 : f32 to vector<3x64xf32>
    %c0_i32_3 = arith.constant 0 : i32
    %c64_i32 = arith.constant 64 : i32
    %7 = arith.addi %c0_i32_3, %c64_i32 : i32
    %c1_i32 = arith.constant 1 : i32
    %8:3 = scf.for %arg3 = %c0_i32_3 to %7 step %c1_i32 iter_args(%arg4 = %4, %arg5 = %5, %arg6 = %6) -> (vector<1x128xf32>, vector<1x1xi32>, vector<3x64xf32>)  : i32 {
      %12 = vector.broadcast %arg5 : vector<1x1xi32> to vector<1x128xi32>
      %13 = arith.cmpi eq, %2, %12 : vector<1x128xi32>
      %cst_8 = arith.constant 0.000000e+00 : f32
      %14 = vector.shape_cast %13 : vector<1x128xi1> to vector<1x128xi1>
      %15 = vector.broadcast %14 : vector<1x128xi1> to vector<3x128xi1>
      %16 = vector.broadcast %cst_8 : f32 to vector<3x128xf32>
      %17 = arith.select %15, %1, %16 : vector<3x128xi1>, vector<3x128xf32>
      %cst_9 = arith.constant dense<0.000000e+00> : vector<3xf32>
      %18 = vector.multi_reduction <add>, %17, %cst_9 [1] : vector<3x128xf32> to vector<3xf32>
      %19 = vector.shape_cast %18 : vector<3xf32> to vector<3x1xf32>
      %20 = vector.broadcast %arg3 : i32 to vector<1x64xi32>
      %21 = arith.cmpi eq, %3, %20 : vector<1x64xi32>
      %22 = vector.shape_cast %19 : vector<3x1xf32> to vector<3x1xf32>
      %23 = vector.broadcast %22 : vector<3x1xf32> to vector<3x64xf32>
      %24 = vector.shape_cast %21 : vector<1x64xi1> to vector<1x64xi1>
      %25 = vector.broadcast %24 : vector<1x64xi1> to vector<3x64xi1>
      %26 = arith.select %25, %23, %arg6 : vector<3x64xi1>, vector<3x64xf32>
      %27 = vector.broadcast %19 : vector<3x1xf32> to vector<3x128xf32>
      %28 = arith.subf %1, %27 : vector<3x128xf32>
      %29 = arith.mulf %28, %28 : vector<3x128xf32>
      %cst_10 = arith.constant dense<0.000000e+00> : vector<128xf32>
      %30 = vector.multi_reduction <add>, %29, %cst_10 [0] : vector<3x128xf32> to vector<128xf32>
      %31 = vector.shape_cast %30 : vector<128xf32> to vector<1x128xf32>
      %32 = arith.minimumf %arg4, %31 : vector<1x128xf32>
      %cst_11 = arith.constant dense<0xFF800000> : vector<1xf32>
      %33 = vector.multi_reduction <maximumf>, %32, %cst_11 [1] : vector<1x128xf32> to vector<1xf32>
      %34 = vector.shape_cast %33 : vector<1xf32> to vector<1x1xf32>
      %35 = vector.broadcast %34 : vector<1x1xf32> to vector<1x128xf32>
      %36 = arith.cmpf oeq, %32, %35 : vector<1x128xf32>
      %c128_i32 = arith.constant 128 : i32
      %37 = vector.broadcast %c128_i32 : i32 to vector<1x128xi32>
      %38 = arith.select %36, %2, %37 : vector<1x128xi1>, vector<1x128xi32>
      %cst_12 = arith.constant dense<2147483647> : vector<1xi32>
      %39 = vector.multi_reduction <minsi>, %38, %cst_12 [1] : vector<1x128xi32> to vector<1xi32>
      %40 = vector.shape_cast %39 : vector<1xi32> to vector<1x1xi32>
      scf.yield %32, %40, %26 : vector<1x128xf32>, vector<1x1xi32>, vector<3x64xf32>
    }
    %c64_i32_4 = arith.constant 64 : i32
    %c0_5 = arith.constant 0 : index
    %c0_6 = arith.constant 0 : index
    %c0_7 = arith.constant 0 : index
    %9 = vector.load %arg2[%c0_5, %c0_6, %c0_7] : memref<1x3x64xf32, #tpu.memory_space<vmem>>, vector<1x3x64xf32>
    %10 = vector.shape_cast %9 : vector<1x3x64xf32> to vector<3x64xf32>
    %11 = vector.shape_cast %8#2 : vector<3x64xf32> to vector<1x3x64xf32>
    tpu.vector_store %arg2[%c0_5, %c0_6, %c0_7], %11 {strides = array<i32>} : memref<1x3x64xf32, #tpu.memory_space<vmem>>, vector<1x3x64xf32>,
    return
  }
  func.func @transform_0(%arg0: i32) -> (i32, i32, i32) {
    %c0_i32 = arith.constant 0 : i32
    %c0_i32_0 = arith.constant 0 : i32
    %c0_i32_1 = arith.constant 0 : i32
    return %arg0, %c0_i32, %c0_i32_0 : i32, i32, i32
  }
  func.func @transform_1(%arg0: i32) -> (i32, i32, i32) {
    %c0_i32 = arith.constant 0 : i32
    %c0_i32_0 = arith.constant 0 : i32
    %c0_i32_1 = arith.constant 0 : i32
    return %arg0, %c0_i32, %c0_i32_0 : i32, i32, i32
  }
}

</mosaic_0001>

<bundles_post_ra>
// kernel: tpu_custom_call.1
= control target key start
LH: loop header
LB: loop body
LE: loop exit
PB: predicated region body
PF: predicated region fallthrough
CT: control target
= control target key end

     0   :  { %s333_s6 = smov 0   ;;  %s362_s0 = inlined_call_operand.vmem [shape: f32[2,3,128], index: 0, kind: input, shape index: {}]   ;;  %s363_s1 = inlined_call_operand.vmem [shape: f32[2,3,64], index: 1, kind: output, shape index: {}]  }
   0x1 LB: > { %s234_s7 = sadd.s32 4294967295, %s305_s6   ;;  %p238_p0 = scmp.ge.s32.totalorder %s305_s6, 1  ;;  %s305_s6 = sphi %s333_s6, %s11_s6  }
   0x2   : > { %p86_p1 = scmp.lt.s32.totalorder %s305_s6, 3 }
   0x4   : > { %p87_p2 = pnand %p238_p0, %p86_p1 }
   0x5   : > { %p104_p3 = scmp.lt.s32.totalorder (!%p87_p2), %s234_s7, 1  ;;  %s349_s15 = smov (!%p87_p2), 0  }
   0x6   : > { %90 = sbr.rel (%p87_p2) target bundleno = 600 (0x258), region = 24 }
   0xb   : > { %v113_v0 = vlaneseq  ;;  %s365_s7 = smov (!%p104_p3, %s234_s7), 1  ;;  %v307_v3 = vmov 0.0   ;;  %v311_v4 = vmov 0   ;;  %v315_v5 = vmov 1e+10  }
   0xc   : > { %s239_s8 = sshll.u32 %s365_s7, 2 }
   0xd   : > { %v114_v1 = vand.u32 127, %v113_v0  ;;  %s107_s11 = scalar_lea.vmem %s362_s0, %s239_s8  ;;  %s347_s14 = scalar_lea.vmem %s363_s1, %s239_s8 }
   0xe   : > { %v112_v2 = vld [vmem:[%s107_s11] sm:$0x7] }
   0xf LB: >> { %vm128_vm0 = vcmask 1042432   ;;  %vm124_vm1 = vcmp.eq.s32.totalorder %v114_v1, %v313_v4  ;;  %v132_v8 = vstv %s321_s15  ;;  %s120_s15 = sadd.s32 1, %s321_s15   ;;  %s321_s15 = sphi %s349_s15, %s120_s15   ;;  %v317_v5 = vphi %v315_v5, %v146_v5   ;;  %v313_v4 = vphi %v311_v4, %v164_v4   ;;  %v309_v3 = vphi %v307_v3, %v308_v3  }
  0x10   : >> { %v127_v6 = vsel %vm124_vm1, %v112_v2, 0.0  ;;  %vm133_vm2 = vcmp.eq.s32.totalorder %v114_v1, %v132_v8  ;;  %p117_p4 = scmp.ge.s32.totalorder %s120_s15, 64  }
  0x11   : >> { %v129_v7 = vsel %vm128_vm0, %v127_v6, 0.0  ;;  %vm165_vm5 = vcmask (%p117_p4), 518144  }
  0x12   : >> { %130 = vadd.xlane.f32.xlu0 %v129_v7 }
  0x9b   : >> { %v131_v9 = vpop.xlane.xlu0 %130 }
  0x9c   : >> { %v136_v10 = vsel %vm133_vm2, %v131_v9, %v309_v3   ;;  %v137_v11 = vsub.f32 %v112_v2, %v131_v9 }
  0x9d   : >> { %v308_v3 = vmov %v136_v10   ;;  %166 = vst.msk [vmem:[%s347_s14] sm:$0x7] (%p117_p4), %vm165_vm5, %v136_v10 }
  0x9e   : >> { %v138_v12 = vmul.f32 %v137_v11, %v137_v11 }
  0xa0   : >> { %v139_v13 = vsel %vm128_vm0, %v138_v12, 0.0 }
  0xa1   : >> { %v140_v14 = vrot.slane %v139_v13, 4 }
  0xa3   : >> { %v141_v15 = vadd.f32 %v140_v14, %v139_v13 }
  0xa5   : >> { %v142_v16 = vrot.slane %v141_v15, 2 }
  0xa7   : >> { %v143_v17 = vadd.f32 %v142_v16, %v141_v15 }
  0xa9   : >> { %v144_v18 = vrot.slane %v143_v17, 1 }
  0xab   : >> { %v145_v19 = vadd.f32 %v144_v18, %v143_v17 }
  0xad   : >> { %v146_v5 = vmin.f32 %v317_v5, %v145_v19  }
  0xaf   : >> { %147 = vmax.xlane.f32.xlu0 %v146_v5 }
 0x138   : >> { %v148_v20 = vpop.xlane.xlu0 %147 }
 0x139   : >> { %vm149_vm3 = vcmp.eq.f32.partialorder %v146_v5, %v148_v20 }
 0x13a   : >> { %v150_v21 = vsel %vm149_vm3, %v114_v1, 128 }
 0x13b   : >> { %v152_v22 = vshra.s32 %v150_v21, 16  ;;  %v151_v24 = vand.u32 65535, %v150_v21 }
 0x13d   : >> { %v154_v23 = vcvt.s32.f32 %v152_v22  ;;  %v153_v25 = vcvt.s32.f32 %v151_v24 }
 0x13f   : >> { %155 = vmin.xlane.f32.xlu1 %v154_v23 }
 0x1c8   : >> { %v156_v26 = vpop.xlane.xlu1 %155 }
 0x1c9   : >> { %vm157_vm4 = vcmp.eq.f32.partialorder %v154_v23, %v156_v26  ;;  %v162_v28 = vcvt.f32.s32 %v156_v26 }
 0x1ca   : >> { %v158_v27 = vsel %vm157_vm4, %v153_v25, inf }
 0x1cb   : >> { %159 = vmin.xlane.f32.xlu1 %v158_v27  ;;  %v163_v30 = vshll.u32 %v162_v28, 16 }
 0x253   : > { %119 = sbr.rel (!%p117_p4) target bundleno = 15 (0xf), region = 61 }
 0x254   : >> { %v160_v29 = vpop.xlane.xlu1 %159 }
 0x255   : >> { %v161_v31 = vcvt.f32.s32 %v160_v29 }
 0x257   : >> { %v164_v4 = vadd.s32 %v163_v30, %v161_v31  }
 0x258 PF: > { %s11_s6 = sadd.s32 1, %s305_s6  }
 0x259   : > { %p8_p5 = scmp.ge.s32.totalorder %s11_s6, 4  }
 0x25b   :  { %10 = sbr.rel (!%p8_p5) target bundleno = 1 (0x1), region = 72 }

</bundles_post_ra>
